<compile_context>
chip_gen: v5e
topology: v5e:2x2
jax: 0.10.0
libtpu: 0.0.40
codegen_flags: <defaults>
</compile_context>

<pallas_src>
import functools

import jax
import jax.numpy as jnp
from jax.experimental import pallas as pl
from jax.experimental.pallas import tpu as pltpu

LANE = 128
SUBLANE = 8
GRANULE = SUBLANE * LANE            # 1024 elements = one (8,128) vreg
MAX_BLOCK_R = 4096                  # (4096,128) f32 = 2 MiB/tile; 2 in x 2 buf = 8 MiB
VMEM_LIMIT_BYTES = 32 * 1024 * 1024  # explicit headroom (safe on v5e/v6e/v7x)


def _full_reduce_1x1(x):
    # (8,128) -> (1,1) via two single-axis keepdims reductions
    # (lane reduce then sublane reduce) — one-off, off the streaming path.
    return jnp.sum(jnp.sum(x, axis=-1, keepdims=True), axis=0, keepdims=True)


def _dice_reduce_kernel(p_ref, t_ref, inter_out_ref, denom_out_ref,
                        inter_acc, denom_acc, *, block_r, nblocks, rows_last):
    """Accumulate sum(sigmoid(p)*t) and sum(sigmoid(p)) + sum(t)."""
    i = pl.program_id(0)

    @pl.when(i == 0)
    def _init():
        inter_acc[...] = jnp.zeros_like(inter_acc)
        denom_acc[...] = jnp.zeros_like(denom_acc)

    x = p_ref[...].astype(jnp.float32)
    t = t_ref[...].astype(jnp.float32)
    # sigmoid(x) == 0.5*(tanh(0.5*x) + 1): single EUP op per element.
    p = 0.5 * (jnp.tanh(0.5 * x) + 1.0)

    def _accumulate(pv, tv):
        # (block_r,128) -> (block_r//8, 8, 128); axis-0 sum = pure VPU adds.
        ps = pv.reshape(block_r // SUBLANE, SUBLANE, LANE)
        ts = tv.reshape(block_r // SUBLANE, SUBLANE, LANE)
        inter_acc[...] += jnp.sum(ps * ts, axis=0)
        denom_acc[...] += jnp.sum(ps + ts, axis=0)

    if rows_last < block_r:
        # Static: only the final grid step reads a partially-valid block,
        # so only that step pays for the row mask.
        @pl.when(i < nblocks - 1)
        def _full_block():
            _accumulate(p, t)

        @pl.when(i == nblocks - 1)
        def _partial_block():
            row_ids = jax.lax.broadcasted_iota(jnp.int32, (block_r, 1), 0)
            valid = row_ids < rows_last
            _accumulate(jnp.where(valid, p, 0.0), jnp.where(valid, t, 0.0))
    else:
        _accumulate(p, t)

    @pl.when(i == nblocks - 1)
    def _finalize():
        inter_out_ref[...] = _full_reduce_1x1(inter_acc[...])
        denom_out_ref[...] = _full_reduce_1x1(denom_acc[...])


def dice_loss_pallas(prediction, target, smooth=1e-7):
    """1 - (2*sum(sigmoid(p)*t) + smooth) / (sum(sigmoid(p)) + sum(t) + smooth).

    Pass logits/targets in their native (narrow) dtype: they are upcast
    inside the kernel, so bf16 inputs halve HBM traffic on this
    memory-bound reduction.
    """
    p = prediction.reshape(-1)       # flatten: free, keeps native dtype
    t = target.reshape(-1)
    n = p.shape[0]

    n_main = (n // GRANULE) * GRANULE    # aligned prefix streamed by the kernel
    inter = jnp.float32(0.0)
    denom = jnp.float32(0.0)

    if n_main > 0:
        rows = n_main // LANE            # multiple of 8
        block_r = min(MAX_BLOCK_R, rows)  # multiple of 8 (or the full dim)
        nblocks = pl.cdiv(rows, block_r)
        rows_last = rows - (nblocks - 1) * block_r

        # Common case (n % 1024 == 0): no slice, no copy, no pad.
        p_main = p if n_main == n else p[:n_main]
        t_main = t if n_main == n else t[:n_main]
        p2 = p_main.reshape(rows, LANE)
        t2 = t_main.reshape(rows, LANE)

        kernel = functools.partial(
            _dice_reduce_kernel,
            block_r=block_r, nblocks=nblocks, rows_last=rows_last)

        scalar_shape = jax.ShapeDtypeStruct((1, 1), jnp.float32)
        scalar_spec = pl.BlockSpec((1, 1), lambda i: (0, 0))

        inter_res, denom_res = pl.pallas_call(
            kernel,
            out_shape=(scalar_shape, scalar_shape),
            grid_spec=pltpu.PrefetchScalarGridSpec(
                num_scalar_prefetch=0,
                grid=(nblocks,),
                in_specs=[
                    pl.BlockSpec((block_r, LANE), lambda i: (i, 0)),
                    pl.BlockSpec((block_r, LANE), lambda i: (i, 0)),
                ],
                out_specs=(scalar_spec, scalar_spec),
                scratch_shapes=[
                    pltpu.VMEM((SUBLANE, LANE), jnp.float32),
                    pltpu.VMEM((SUBLANE, LANE), jnp.float32),
                ],
            ),
            compiler_params=pltpu.CompilerParams(
                dimension_semantics=("arbitrary",),
                vmem_limit_bytes=VMEM_LIMIT_BYTES),
        )(p2, t2)

        inter = inter_res[0, 0]
        denom = denom_res[0, 0]

    if n_main < n:
        # <1024-element ragged tail: reduce in plain JAX (O(1 KiB)); avoids the
        # whole-array pad pass and any pad-value tricks entirely.
        pt = jax.nn.sigmoid(p[n_main:].astype(jnp.float32))
        tt = t[n_main:].astype(jnp.float32)
        inter = inter + jnp.sum(pt * tt)
        denom = denom + jnp.sum(pt) + jnp.sum(tt)

    dice_score = (2.0 * inter + smooth) / (denom + smooth)
    return 1.0 - dice_score


def dice_loss_ref(prediction, target, smooth=1e-7):
    """Plain-JAX reference matching the PyTorch forward."""
    p = jax.nn.sigmoid(prediction.astype(jnp.float32)).reshape(-1)
    t = target.astype(jnp.float32).reshape(-1)
    inter = jnp.sum(p * t)
    dice_score = (2.0 * inter + smooth) / (jnp.sum(p) + jnp.sum(t) + smooth)
    return 1.0 - dice_score


if __name__ == "__main__":
    key = jax.random.PRNGKey(0)
    k1, k2, k3, k4 = jax.random.split(key, 4)
    loss_fn = jax.jit(dice_loss_pallas)

    # 1) Small aligned input: N=2, C=4, H=W=16 (single block, no mask, no tail).
    pred = jax.random.normal(k1, (2, 4, 16, 16), dtype=jnp.float32)
    targ = (jax.random.uniform(k2, (2, 4, 16, 16)) > 0.5).astype(jnp.float32)
    loss = jax.block_until_ready(loss_fn(pred, targ))
    ref = dice_loss_ref(pred, targ)
    assert jnp.allclose(loss, ref, atol=1e-4, rtol=1e-4), (loss, ref)

    # 2) Multi-block accumulation path: rows=16384, block=4096, grid=(4,).
    pred2 = jax.random.normal(k3, (2, 4, 512, 512), dtype=jnp.float32)
    targ2 = (jax.random.uniform(k4, (2, 4, 512, 512)) > 0.5).astype(jnp.float32)
    loss2 = jax.block_until_ready(loss_fn(pred2, targ2))
    ref2 = dice_loss_ref(pred2, targ2)
    assert jnp.allclose(loss2, ref2, atol=1e-4, rtol=1e-4), (loss2, ref2)

    # 3) Partial last block (gated row-mask path): rows=9600, block=4096.
    pred3 = jax.random.normal(k1, (1, 3, 640, 640), dtype=jnp.float32)
    targ3 = (jax.random.uniform(k2, (1, 3, 640, 640)) > 0.5).astype(jnp.float32)
    loss3 = jax.block_until_ready(loss_fn(pred3, targ3))
    ref3 = dice_loss_ref(pred3, targ3)
    assert jnp.allclose(loss3, ref3, atol=1e-4, rtol=1e-4), (loss3, ref3)

    # 4) Native bf16 logits + ragged element count (plain-JAX tail path).
    pred4 = jax.random.normal(k3, (2, 3, 17, 19), dtype=jnp.bfloat16)
    targ4 = (jax.random.uniform(k4, (2, 3, 17, 19)) > 0.5).astype(jnp.float32)
    loss4 = jax.block_until_ready(loss_fn(pred4, targ4))
    ref4 = dice_loss_ref(pred4, targ4)
    assert jnp.allclose(loss4, ref4, atol=1e-4, rtol=1e-4), (loss4, ref4)

    print("KERNEL_OK")
</pallas_src>

<mosaic_0001>
module attributes {stable_mosaic.version = 11 : i64} {
  func.func @_dice_reduce_kernel(%arg0: i32, %arg1: memref<16x128xf32, #tpu.memory_space<vmem>>, %arg2: memref<16x128xf32, #tpu.memory_space<vmem>>, %arg3: memref<1x1xf32, #tpu.memory_space<vmem>>, %arg4: memref<1x1xf32, #tpu.memory_space<vmem>>, %arg5: memref<8x128xf32, #tpu.memory_space<vmem>>, %arg6: memref<8x128xf32, #tpu.memory_space<vmem>>) attributes {dimension_semantics = [#tpu.dimension_semantics<arbitrary>], iteration_bounds = array<i64: 1>, scalar_prefetch = 0 : i64, scratch_operands = 2 : i64, tpu.core_type = #tpu.core_type<tc>, window_params = [{transform_indices = @transform_0, window_bounds = array<i64: 16, 128>}, {transform_indices = @transform_1, window_bounds = array<i64: 16, 128>}, {pipeline_mode = #tpu.pipeline_mode<synchronous>, transform_indices = @transform_2, window_bounds = array<i64: 1, 1>}, {pipeline_mode = #tpu.pipeline_mode<synchronous>, transform_indices = @transform_3, window_bounds = array<i64: 1, 1>}]} {
    %c0_i32 = arith.constant 0 : i32
    %0 = arith.cmpi eq, %arg0, %c0_i32 : i32
    %1 = arith.extui %0 : i1 to i32
    %c0_i32_0 = arith.constant 0 : i32
    %2 = arith.cmpi ne, %1, %c0_i32_0 : i32
    scf.if %2 {
      %cst_18 = arith.constant 0.000000e+00 : f32
      %27 = vector.broadcast %cst_18 : f32 to vector<8x128xf32>
      %c0_19 = arith.constant 0 : index
      %c0_20 = arith.constant 0 : index
      %28 = vector.load %arg5[%c0_19, %c0_20] : memref<8x128xf32, #tpu.memory_space<vmem>>, vector<8x128xf32>
      tpu.vector_store %arg5[%c0_19, %c0_20], %27 {strides = array<i32>} : memref<8x128xf32, #tpu.memory_space<vmem>>, vector<8x128xf32>,
      %cst_21 = arith.constant 0.000000e+00 : f32
      %29 = vector.broadcast %cst_21 : f32 to vector<8x128xf32>
      %c0_22 = arith.constant 0 : index
      %c0_23 = arith.constant 0 : index
      %30 = vector.load %arg6[%c0_22, %c0_23] : memref<8x128xf32, #tpu.memory_space<vmem>>, vector<8x128xf32>
      tpu.vector_store %arg6[%c0_22, %c0_23], %29 {strides = array<i32>} : memref<8x128xf32, #tpu.memory_space<vmem>>, vector<8x128xf32>,
    } else {
    }
    %c0 = arith.constant 0 : index
    %c0_1 = arith.constant 0 : index
    %3 = vector.load %arg1[%c0, %c0_1] : memref<16x128xf32, #tpu.memory_space<vmem>>, vector<16x128xf32>
    %c0_2 = arith.constant 0 : index
    %c0_3 = arith.constant 0 : index
    %4 = vector.load %arg2[%c0_2, %c0_3] : memref<16x128xf32, #tpu.memory_space<vmem>>, vector<16x128xf32>
    %cst = arith.constant 5.000000e-01 : f32
    %5 = vector.broadcast %cst : f32 to vector<16x128xf32>
    %6 = arith.mulf %5, %3 : vector<16x128xf32>
    %7 = math.tanh %6 : vector<16x128xf32>
    %cst_4 = arith.constant 1.000000e+00 : f32
    %8 = vector.broadcast %cst_4 : f32 to vector<16x128xf32>
    %9 = arith.addf %7, %8 : vector<16x128xf32>
    %cst_5 = arith.constant 5.000000e-01 : f32
    %10 = vector.broadcast %cst_5 : f32 to vector<16x128xf32>
    %11 = arith.mulf %10, %9 : vector<16x128xf32>
    %12 = vector.shape_cast %11 : vector<16x128xf32> to vector<2x8x128xf32>
    %13 = vector.shape_cast %4 : vector<16x128xf32> to vector<2x8x128xf32>
    %c0_6 = arith.constant 0 : index
    %c0_7 = arith.constant 0 : index
    %14 = vector.load %arg5[%c0_6, %c0_7] : memref<8x128xf32, #tpu.memory_space<vmem>>, vector<8x128xf32>
    %15 = arith.mulf %12, %13 : vector<2x8x128xf32>
    %cst_8 = arith.constant dense<0.000000e+00> : vector<8x128xf32>
    %16 = vector.multi_reduction <add>, %15, %cst_8 [0] : vector<2x8x128xf32> to vector<8x128xf32>
    %17 = arith.addf %14, %16 : vector<8x128xf32>
    %c0_9 = arith.constant 0 : index
    %c0_10 = arith.constant 0 : index
    %18 = vector.load %arg5[%c0_9, %c0_10] : memref<8x128xf32, #tpu.memory_space<vmem>>, vector<8x128xf32>
    tpu.vector_store %arg5[%c0_9, %c0_10], %17 {strides = array<i32>} : memref<8x128xf32, #tpu.memory_space<vmem>>, vector<8x128xf32>,
    %c0_11 = arith.constant 0 : index
    %c0_12 = arith.constant 0 : index
    %19 = vector.load %arg6[%c0_11, %c0_12] : memref<8x128xf32, #tpu.memory_space<vmem>>, vector<8x128xf32>
    %20 = arith.addf %12, %13 : vector<2x8x128xf32>
    %cst_13 = arith.constant dense<0.000000e+00> : vector<8x128xf32>
    %21 = vector.multi_reduction <add>, %20, %cst_13 [0] : vector<2x8x128xf32> to vector<8x128xf32>
    %22 = arith.addf %19, %21 : vector<8x128xf32>
    %c0_14 = arith.constant 0 : index
    %c0_15 = arith.constant 0 : index
    %23 = vector.load %arg6[%c0_14, %c0_15] : memref<8x128xf32, #tpu.memory_space<vmem>>, vector<8x128xf32>
    tpu.vector_store %arg6[%c0_14, %c0_15], %22 {strides = array<i32>} : memref<8x128xf32, #tpu.memory_space<vmem>>, vector<8x128xf32>,
    %c0_i32_16 = arith.constant 0 : i32
    %24 = arith.cmpi eq, %arg0, %c0_i32_16 : i32
    %25 = arith.extui %24 : i1 to i32
    %c0_i32_17 = arith.constant 0 : i32
    %26 = arith.cmpi ne, %25, %c0_i32_17 : i32
    scf.if %26 {
      %c0_18 = arith.constant 0 : index
      %c0_19 = arith.constant 0 : index
      %27 = vector.load %arg5[%c0_18, %c0_19] : memref<8x128xf32, #tpu.memory_space<vmem>>, vector<8x128xf32>
      %cst_20 = arith.constant dense<0.000000e+00> : vector<8xf32>
      %28 = vector.multi_reduction <add>, %27, %cst_20 [1] : vector<8x128xf32> to vector<8xf32>
      %29 = vector.shape_cast %28 : vector<8xf32> to vector<8x1xf32>
      %cst_21 = arith.constant dense<0.000000e+00> : vector<1xf32>
      %30 = vector.multi_reduction <add>, %29, %cst_21 [0] : vector<8x1xf32> to vector<1xf32>
      %31 = vector.shape_cast %30 : vector<1xf32> to vector<1x1xf32>
      %c0_22 = arith.constant 0 : index
      %c0_23 = arith.constant 0 : index
      %32 = vector.load %arg3[%c0_22, %c0_23] : memref<1x1xf32, #tpu.memory_space<vmem>>, vector<1x1xf32>
      tpu.vector_store %arg3[%c0_22, %c0_23], %31 {strides = array<i32>} : memref<1x1xf32, #tpu.memory_space<vmem>>, vector<1x1xf32>,
      %c0_24 = arith.constant 0 : index
      %c0_25 = arith.constant 0 : index
      %33 = vector.load %arg6[%c0_24, %c0_25] : memref<8x128xf32, #tpu.memory_space<vmem>>, vector<8x128xf32>
      %cst_26 = arith.constant dense<0.000000e+00> : vector<8xf32>
      %34 = vector.multi_reduction <add>, %33, %cst_26 [1] : vector<8x128xf32> to vector<8xf32>
      %35 = vector.shape_cast %34 : vector<8xf32> to vector<8x1xf32>
      %cst_27 = arith.constant dense<0.000000e+00> : vector<1xf32>
      %36 = vector.multi_reduction <add>, %35, %cst_27 [0] : vector<8x1xf32> to vector<1xf32>
      %37 = vector.shape_cast %36 : vector<1xf32> to vector<1x1xf32>
      %c0_28 = arith.constant 0 : index
      %c0_29 = arith.constant 0 : index
      %38 = vector.load %arg4[%c0_28, %c0_29] : memref<1x1xf32, #tpu.memory_space<vmem>>, vector<1x1xf32>
      tpu.vector_store %arg4[%c0_28, %c0_29], %37 {strides = array<i32>} : memref<1x1xf32, #tpu.memory_space<vmem>>, vector<1x1xf32>,
    } else {
    }
    return
  }
  func.func @transform_0(%arg0: i32) -> (i32, i32) {
    %c0_i32 = arith.constant 0 : i32
    %c0_i32_0 = arith.constant 0 : i32
    return %arg0, %c0_i32 : i32, i32
  }
  func.func @transform_1(%arg0: i32) -> (i32, i32) {
    %c0_i32 = arith.constant 0 : i32
    %c0_i32_0 = arith.constant 0 : i32
    return %arg0, %c0_i32 : i32, i32
  }
  func.func @transform_2(%arg0: i32) -> (i32, i32) {
    %c0_i32 = arith.constant 0 : i32
    %c0_i32_0 = arith.constant 0 : i32
    %c0_i32_1 = arith.constant 0 : i32
    return %c0_i32, %c0_i32_0 : i32, i32
  }
  func.func @transform_3(%arg0: i32) -> (i32, i32) {
    %c0_i32 = arith.constant 0 : i32
    %c0_i32_0 = arith.constant 0 : i32
    %c0_i32_1 = arith.constant 0 : i32
    return %c0_i32, %c0_i32_0 : i32, i32
  }
}

</mosaic_0001>

<bundles_post_ra>
// kernel: dice_loss_pallas.1
= control target key start
LH: loop header
LB: loop body
LE: loop exit
PB: predicated region body
PF: predicated region fallthrough
CT: control target
= control target key end

     0   :  { %9 = vsyncpa [#allocation5], 0  ;;  %s201_s0 = inlined_call_operand.vmem [shape: f32[16,128], index: 0, kind: input, shape index: {}]   ;;  %s202_s1 = inlined_call_operand.vmem [shape: f32[16,128], index: 1, kind: input, shape index: {}]   ;;  %s203_s2 = inlined_call_operand.hbm [shape: f32[1,1], index: 2, kind: output, shape index: {0}]   ;;  %s204_s3 = inlined_call_operand.hbm [shape: f32[1,1], index: 3, kind: output, shape index: {1}]  }
   0x1   :  { %v21_v0 = vld [vmem:[%s201_s0] sm:$0xff]  ;;  %v22_v1 = vld [vmem:[%s201_s0 + $0x8] sm:$0xff] }
   0x2   :  { %v25_v2 = vmul.f32 0.5, %v21_v0  ;;  %v26_v3 = vmul.f32 0.5, %v22_v1 }
   0x3   :  { %10 = vsyncpa [#allocation7], 0  ;;  %v23_v7 = vld [vmem:[%s202_s1] sm:$0xff]  ;;  %v24_v9 = vld [vmem:[%s202_s1 + $0x8] sm:$0xff]  ;;  %s159_s0 = smov [#allocation4]   ;;  %s76_s22 = sshll.u32 %s203_s2, 4  ;;  %s77_s22 = int_to_ptr.hbm [resolvable:$true] %s76_s22 }
   0x4   :  { %103 = vtanh.f32 %v25_v2  ;;  %s74_s20 = sshll.u32 %s159_s0, 4  ;;  %vm57_vm0 = vcmask 0   ;;  %s160_s23 = smov [#allocation6]   ;;  %s75_s20 = int_to_ptr.vmem [resolvable:$true] %s74_s20 }
   0x5   :  { %105 = vtanh.f32 %v26_v3  ;;  %s85_s24 = sshll.u32 %s160_s23, 4  ;;  %s87_s27 = sshll.u32 %s204_s3, 4  ;;  %s86_s24 = int_to_ptr.vmem [resolvable:$true] %s85_s24  ;;  %s88_s27 = int_to_ptr.hbm [resolvable:$true] %s87_s27 }
   0xa   :  { %v104_v4 = vpop.eup %103 }
   0xb   :  { %v106_v5 = vpop.eup %105  ;;  %v29_v6 = vadd.f32 1.0, %v104_v4 }
   0xc   :  { %v30_v8 = vadd.f32 1.0, %v106_v5 }
   0xd   :  { %v31_v10 = vmul.f32 0.5, %v29_v6 }
   0xe   :  { %v32_v11 = vmul.f32 0.5, %v30_v8 }
   0xf   :  { %v34_v12 = vmul.f32 %v31_v10, %v23_v7  ;;  %v40_v15 = vadd.f32 %v31_v10, %v23_v7 }
  0x10   :  { %v35_v13 = vmul.f32 %v32_v11, %v24_v9  ;;  %v41_v16 = vadd.f32 %v32_v11, %v24_v9 }
  0x12   :  { %v36_v14 = vadd.f32 %v35_v13, %v34_v12  ;;  %v42_v17 = vadd.f32 %v41_v16, %v40_v15 }
  0x14   :  { %49 = vadd.xlane.f32.xlu0 %v36_v14 }
  0x1c   :  { %60 = vadd.xlane.f32.xlu0 %v42_v17 }
  0x87   :  { %v50_v18 = vpop.xlane.xlu0 %49 }
  0x88   :  { %v51_v19 = vrot.slane %v50_v18, 4 }
  0x8a   :  { %v52_v20 = vadd.f32 %v51_v19, %v50_v18 }
  0x8c   :  { %v53_v21 = vrot.slane %v52_v20, 2 }
  0x8e   :  { %v54_v22 = vadd.f32 %v53_v21, %v52_v20 }
  0x8f   :  { %v61_v23 = vpop.xlane.xlu0 %60 }
  0x90   :  { %v62_v24 = vrot.slane %v61_v23, 4  ;;  %v55_v25 = vrot.slane %v54_v22, 1 }
  0x92   :  { %v63_v26 = vadd.f32 %v62_v24, %v61_v23  ;;  %v56_v27 = vadd.f32 %v55_v25, %v54_v22 }
  0x94   :  { %v64_v28 = vrot.slane %v63_v26, 2  ;;  %58 = vst.msk [vmem:[#allocation4] sm:$0x1] %vm57_vm0, %v56_v27 }
  0x95   :  { %79 = dma.vmem_to_hbm [thread:$0]  %s75_s20, 16, %s77_s22, [#allocation5]  }
  0x96   :  { %v65_v29 = vadd.f32 %v64_v28, %v63_v26 }
  0x98   :  { %v66_v30 = vrot.slane %v65_v29, 1 }
  0x9a   :  { %v67_v31 = vadd.f32 %v66_v30, %v65_v29 }
  0x9c   :  { %68 = vst.msk [vmem:[#allocation6] sm:$0x1] %vm57_vm0, %v67_v31 }
  0x9d   :  { %90 = dma.vmem_to_hbm [thread:$0]  %s86_s24, 16, %s88_s27, [#allocation7]  }
  0x9e   :  { %155 = dma.done.wait [#allocation5], 16  }
  0x9f   :  { %156 = vsyncadd [#allocation5], 4294967280 }
  0xa0   :  { %157 = dma.done.wait [#allocation7], 16  }
  0xa1   :  { %158 = vsyncadd [#allocation7], 4294967280 }
  0xa2   :  { %99 = vsyncpa [#allocation5], 1 }
  0xa3   :  { %100 = vsyncpa [#allocation7], 1 }

</bundles_post_ra>
